<compile_context>
chip_gen: v7x
topology: tpu7x:2x2x1
jax: 0.10.0
libtpu: 0.0.40
codegen_flags: <defaults>
</compile_context>

<pallas_src>
import functools

import jax
import jax.numpy as jnp
from jax.experimental import pallas as pl
from jax.experimental.pallas import tpu as pltpu

_LANE = 128


def _sublane_pack(itemsize: int) -> int:
    # vreg tiles: (8,128) for 32-bit, (16,128) for 16-bit, (32,128) for 8-bit.
    return {4: 8, 2: 16, 1: 32}.get(itemsize, 8)


def _target_block_bytes() -> int:
    # ~4 MiB blocks on v6e/v7x (2 in + 2 out buffers = 16 MiB < 32 MiB scoped
    # VMEM); conservative 2 MiB elsewhere (v5e default scoped VMEM is 16 MiB).
    try:
        kind = jax.devices()[0].device_kind.lower()
    except Exception:
        kind = ""
    if ("v6" in kind) or ("v7" in kind) or ("7x" in kind):
        return 4 * 1024 * 1024
    return 2 * 1024 * 1024


# ---------------------------------------------------------------------------
# Kernel: elementwise  max(x, bound)^2 - pedestal   on one (block_rows, 128) tile
# ---------------------------------------------------------------------------
def _nonneg_fwd_kernel(x_ref, o_ref, *, bound, pedestal):
    x = x_ref[...].astype(jnp.float32)
    lb = jnp.maximum(x, bound)              # lower_bound forward pass
    o_ref[...] = (lb * lb - pedestal).astype(o_ref.dtype)


def nonneg_parameterization_forward(x, *, minimum=0.0, offset=2.0 ** (-18),
                                    min_pallas_bytes=128 * 1024):
    """Pallas forward of NonNegativeParameterization on an arbitrary-shaped x."""
    pedestal = float(offset) ** 2
    bound = (float(minimum) + pedestal) ** 0.5

    orig_shape = x.shape
    dtype = x.dtype
    itemsize = jnp.dtype(dtype).itemsize
    n = x.size

    # --- small-tensor fast path: launch/DMA overhead dominates tiny params ---
    if n == 0 or n * itemsize < min_pallas_bytes:
        y = jnp.square(jnp.maximum(x.astype(jnp.float32), bound)) - pedestal
        return y.astype(dtype)

    # --- lane-dense 2D layout (rows, 128), sublane-pack aligned rows ---------
    pack = _sublane_pack(itemsize)
    rows = -(-n // _LANE)
    rows = -(-rows // pack) * pack
    pad = rows * _LANE - n                   # 0 whenever n is 128*pack aligned

    # Block size: per-generation target bytes, pack-aligned row count.
    max_rows = max(pack, (_target_block_bytes() // (_LANE * itemsize)) // pack * pack)
    block_rows = min(rows, max_rows)
    # v7x megacore: ensure >= 2 grid blocks whenever splittable so the
    # "parallel" axis can be sharded across both TensorCores.
    if block_rows == rows and rows >= 2 * pack:
        block_rows = -(-((rows + 1) // 2) // pack) * pack
    # Ragged last block: Pallas clips the write-back DMA past `rows`, so no
    # rounding of `rows` (and hence no pad/slice) is needed for aligned n.
    num_blocks = -(-rows // block_rows)

    flat = x.reshape(-1)
    if pad:
        # TODO(synk): unaligned sizes still pay one pad + one slice full-tensor
        # copy; large parameters are normally 128*pack aligned so this is rare.
        flat = jnp.pad(flat, (0, pad))
    x2d = flat.reshape(rows, _LANE)

    cost = pl.CostEstimate(
        flops=3 * n, transcendentals=0, bytes_accessed=2 * n * itemsize)
    kernel = functools.partial(_nonneg_fwd_kernel, bound=bound, pedestal=pedestal)

    out2d = pl.pallas_call(
        kernel,
        out_shape=jax.ShapeDtypeStruct((rows, _LANE), dtype),
        grid=(num_blocks,),
        in_specs=[pl.BlockSpec((block_rows, _LANE), lambda i: (i, 0))],
        out_specs=pl.BlockSpec((block_rows, _LANE), lambda i: (i, 0)),
        compiler_params=pltpu.CompilerParams(
            dimension_semantics=("parallel",)),
        cost_estimate=cost,
    )(x2d)

    if pad:
        return out2d.reshape(-1)[:n].reshape(orig_shape)
    return out2d.reshape(orig_shape)


# ---------------------------------------------------------------------------
# Parameter setup glue (mirrors __init__): the reparameterized stored value is
#   x = sqrt(max(initial_value + pedestal, pedestal))
# ---------------------------------------------------------------------------
def reparameterize_initial_value(initial_value, *, offset=2.0 ** (-18)):
    pedestal = jnp.asarray(offset ** 2, initial_value.dtype)
    return jnp.sqrt(jnp.maximum(initial_value + pedestal, pedestal))


if __name__ == "__main__":
    minimum = 0.0
    offset = 2.0 ** (-18)
    pedestal = offset ** 2
    bound = (minimum + pedestal) ** 0.5

    key = jax.random.PRNGKey(0)
    k1, k2, k3, k4 = jax.random.split(key, 4)

    # Small NCHW parameter (2,4,16,16): default wrapper takes the jnp fast path.
    init_small = jax.random.uniform(k1, (2, 4, 16, 16), jnp.float32, -0.1, 1.0)
    x_small = reparameterize_initial_value(init_small, offset=offset)

    # Medium aligned parameter (2,4,64,64) = 128 KiB: multi-block Pallas path.
    init_med = jax.random.uniform(k2, (2, 4, 64, 64), jnp.float32, -0.1, 1.0)
    x_med = reparameterize_initial_value(init_med, offset=offset)

    # (3,8,128): forced Pallas, exercises the ragged last block (24 rows, 16-row blocks).
    init_rag = jax.random.uniform(k3, (3, 8, 128), jnp.float32, -0.1, 1.0)
    x_rag = reparameterize_initial_value(init_rag, offset=offset)

    # (5,7,9): forced Pallas, exercises the unaligned pad fallback.
    init_odd = jax.random.uniform(k4, (5, 7, 9), jnp.float32, -0.1, 1.0)
    x_odd = reparameterize_initial_value(init_odd, offset=offset)

    def ref(x):
        return jnp.maximum(x, bound) ** 2 - pedestal

    cases = [
        ("small_fastpath", x_small, {}),
        ("small_pallas", x_small, {"min_pallas_bytes": 0}),
        ("medium_pallas", x_med, {}),
        ("ragged_pallas", x_rag, {"min_pallas_bytes": 0}),
        ("odd_pallas", x_odd, {"min_pallas_bytes": 0}),
    ]
    for name, x, kw in cases:
        out = nonneg_parameterization_forward(
            x, minimum=minimum, offset=offset, **kw)
        out = jax.block_until_ready(out)
        r = ref(x)
        assert out.shape == x.shape and out.dtype == x.dtype, name
        assert jnp.allclose(out, r, atol=1e-6, rtol=1e-6), name

    print("KERNEL_OK")
</pallas_src>

<mosaic_0001>
module attributes {stable_mosaic.version = 11 : i64} {
  func.func @_nonneg_fwd_kernel(%arg0: i32, %arg1: memref<8x128xf32, #tpu.memory_space<vmem>>, %arg2: memref<8x128xf32, #tpu.memory_space<vmem>>) attributes {dimension_semantics = [#tpu.dimension_semantics<parallel>], iteration_bounds = array<i64: 2>, scalar_prefetch = 0 : i64, scratch_operands = 0 : i64, tpu.core_type = #tpu.core_type<tc>, window_params = [{transform_indices = @transform_0, window_bounds = array<i64: 8, 128>}, {transform_indices = @transform_1, window_bounds = array<i64: 8, 128>}]} {
    %c0 = arith.constant 0 : index
    %c0_0 = arith.constant 0 : index
    %0 = vector.load %arg1[%c0, %c0_0] : memref<8x128xf32, #tpu.memory_space<vmem>>, vector<8x128xf32>
    %cst = arith.constant 3.81469727E-6 : f32
    %1 = vector.broadcast %cst : f32 to vector<8x128xf32>
    %2 = arith.maximumf %0, %1 : vector<8x128xf32>
    %3 = arith.mulf %2, %2 : vector<8x128xf32>
    %cst_1 = arith.constant 1.45519152E-11 : f32
    %4 = vector.broadcast %cst_1 : f32 to vector<8x128xf32>
    %5 = arith.subf %3, %4 : vector<8x128xf32>
    %c0_2 = arith.constant 0 : index
    %c0_3 = arith.constant 0 : index
    %6 = vector.load %arg2[%c0_2, %c0_3] : memref<8x128xf32, #tpu.memory_space<vmem>>, vector<8x128xf32>
    tpu.vector_store %arg2[%c0_2, %c0_3], %5 {strides = array<i32>} : memref<8x128xf32, #tpu.memory_space<vmem>>, vector<8x128xf32>,
    return
  }
  func.func @transform_0(%arg0: i32) -> (i32, i32) {
    %c0_i32 = arith.constant 0 : i32
    %c0_i32_0 = arith.constant 0 : i32
    return %arg0, %c0_i32 : i32, i32
  }
  func.func @transform_1(%arg0: i32) -> (i32, i32) {
    %c0_i32 = arith.constant 0 : i32
    %c0_i32_0 = arith.constant 0 : i32
    return %arg0, %c0_i32 : i32, i32
  }
}

</mosaic_0001>

<bundles_post_ra>
// kernel: tpu_custom_call.1
= control target key start
LH: loop header
LB: loop body
LE: loop exit
PB: predicated region body
PF: predicated region fallthrough
CT: control target
= control target key end

     0   :  { %6 = vsyncpa [#allocation3], 0  ;;  %s551_s0 = inlined_call_operand.hbm [shape: f32[16,128], index: 0, kind: input, shape index: {}]   ;;  %s552_s1 = inlined_call_operand.hbm [shape: f32[16,128], index: 1, kind: output, shape index: {}]  }
   0x1   :  { %8 = vsyncpa [#allocation3 + $0x1], 0 }
   0x2   :  { %9 = vsyncpa [#allocation4], 0 }
   0x3   :  { %11 = vsyncpa [#allocation4 + $0x1], 0  ;;  %s390_s6 = smov 0   ;;  %s392_s7 = smov 0  }
   0x4   :  { %s394_s8 = smov 0   ;;  %s396_s9 = smov 0  }
   0x5 LB: > { %s411_s10 = sadd.s32 4294967295, %s376_s9   ;;  %s221_s11 = sadd.s32 4294967294, %s376_s9   ;;  %s376_s9 = sphi %s396_s9, %s567_s9   ;;  %s372_s8 = sphi %s394_s8, %s566_s8   ;;  %s368_s7 = sphi %s392_s7, %s565_s7   ;;  %s364_s6 = sphi %s390_s6, %s564_s6  }
   0x6   : > { %s415_s12 = sadd.s32 1, %s376_s9   ;;  %s24_s13 = sadd.s32 1, %s372_s8 }
   0x7   : > { %s21_s14 = ssub.s32 %s376_s9, %s415_s12  ;;  %p31_p0 = scmp.ne.s32.totalorder %s372_s8, %s368_s7 }
   0x8   : > { %p22_p1 = scmp.eq.s32.totalorder %s21_s14, 0  ;;  %p32_p2 = scmp.eq.s32.totalorder %s376_s9, 0 }
   0x9   : > { %p37_p3 = scmp.ne.s32.totalorder %s368_s7, %s364_s6  ;;  %p38_p4 = scmp.eq.s32.totalorder %s411_s10, 0 }
   0xa   : > { %s427_s15 = scalar_select %p22_p1, %s372_s8, %s24_s13  }
   0xb   : > { %p429_p5 = por %p32_p2, %p31_p0  ;;  %p433_p6 = por %p38_p4, %p37_p3 }
   0xc   : > { %p61_p7 = scmp.eq.s32.totalorder %s411_s10, 1  ;;  %p67_p8 = scmp.eq.s32.totalorder %s221_s11, 1 }
   0xd   : > { %p246_p10 = scmp.lt.s32.totalorder %s376_s9, 2  ;;  %s87_s20 = sand.u32 1, %s372_s8  }
   0xe   : > { %p440_p11 = por %p61_p7, %p31_p0  ;;  %p444_p12 = por %p67_p8, %p37_p3 }
   0xf   : > { %s225_s21 = sshll.u32 %s376_s9, 7  ;;  %s224_s22 = sshll.u32 %s87_s20, 3 }
  0x10   : > { %s556_s18 = scalar_select %p440_p11, 1, 0 }
  0x11   : > { %s557_s19 = scalar_select %p444_p12, 1, 0 }
  0x12   : > { %s453_s25 = scalar_lea.hbm %s551_s0, %s225_s21  ;;  %s91_s26 = scalar_lea.vmem [#allocation2], %s224_s22 }
  0x13   : > { %s98_s27 = sshll.u32 %s91_s26, 4  ;;  %p457_p13 = pnand %p246_p10, %p429_p5  ;;  %s461_s27 = int_to_ptr.vmem [resolvable:$true] %s98_s27 }
  0x14   : > { %s88_s29 = scalar_lea.sflag [#allocation3], %s87_s20  ;;  %s280_s30 = scalar_lea.hbm %s453_s25, 128 }
  0x15   : > { %p281_p2 = scmp.ne.s32.totalorder %s453_s25, %s280_s30  ;;  %p282_p3 = pneg %p457_p13 }
  0x16   : > { %s285_s4 = scalar_lea.hbm %s551_s0, 256  ;;  %p286_p5 = scmp.lt.u32.totalorder %s453_s25, %s551_s0 }
  0x17   : > { %p283_p4 = pnand %p282_p3, %p281_p2  ;;  %p287_p8 = scmp.lt.u32.totalorder %s285_s4, %s280_s30 }
  0x18   : > { %p289_p9 = scmp.lt.u32.totalorder %s280_s30, %s453_s25 }
  0x19   : > { %p284_p7 = pneg %p283_p4  ;;  %p288_p10 = por %p287_p8, %p286_p5 }
  0x1b   : > { %p290_p0 = por %p289_p9, %p288_p10 }
  0x1d   : > { %p291_p1 = pnand %p290_p0, %p284_p7 }
  0x1f   : > { %294 = shalt.err (!%p291_p1)
}
  0x20   : > { %s295_s13 = scalar_lea.vmem %s461_s27, 128  ;;  %s378_s14 = smov [#allocation2]  }
  0x21   : > { %p296_p2 = scmp.ne.s32.totalorder %s461_s27, %s295_s13  ;;  %s300_s16 = sshll.u32 %s378_s14, 4  ;;  %s301_s16 = int_to_ptr.vmem [resolvable:$false] %s300_s16 }
  0x22   : > { %s302_s20 = scalar_lea.vmem %s301_s16, 256  ;;  %p303_p11 = scmp.lt.s32.totalorder %s461_s27, %s301_s16 }
  0x23   : > { %p298_p4 = pnand %p296_p2, %p282_p3  ;;  %p304_p5 = scmp.lt.s32.totalorder %s302_s20, %s295_s13 }
  0x25   : > { %p299_p12 = pneg %p298_p4  ;;  %p305_p8 = por %p304_p5, %p303_p11 }
  0x27   : > { %p306_p9 = pnand %p305_p8, %p299_p12 }
  0x29   : > { %309 = shalt.err (!%p306_p9)
}
  0x2a   : > { %241 = dma.hbm_to_vmem [thread:$0]  (!%p457_p13), %s453_s25, 128, %s461_s27, %s88_s29  }
  0x2b   : > { %p559_p0 = scmp.lt.s32.totalorder %s376_s9, 3  ;;  %p560_p1 = scmp.ge.s32.totalorder %s376_s9, 1 }
  0x2d   : > { %p104_p3 = pnand %p560_p1, %p559_p0 }
  0x2e   : > { %s495_s21 = sand.u32 (!%p104_p3), 1, %s368_s7  }
  0x2f   : > { %107 = sbr.rel (%p104_p3) target bundleno = 81 (0x51), region = 24  ;;  %s227_s22 = sshll.u32 (!%p104_p3), %s495_s21, 3 }
  0x30   : > { %s110_s23 = scalar_lea.sflag (!%p104_p3), [#allocation3], %s495_s21  ;;  %s113_s24 = scalar_lea.vmem (!%p104_p3), [#allocation2], %s227_s22 }
  0x36   : > { %355 = dma.done.wait (%p433_p6), %s110_s23, 128  }
  0x37   : > { %357 = vsyncadd (%p433_p6), %s110_s23, 4294967168  ;;  %v132_v0 = vld [vmem:[%s113_s24] sm:$0xff]  ;;  %s131_s25 = scalar_lea.vmem [#allocation5], %s227_s22  ;;  %s231_s27 = sshll.u32 %s411_s10, 7 }
  0x38   : > { %v133_v1 = vmax.f32 %v132_v0, 3.8146973e-06  ;;  %s151_s26 = sshll.u32 %s131_s25, 4  ;;  %s509_s17 = scalar_lea.hbm %s552_s1, %s231_s27  ;;  %s504_s26 = int_to_ptr.vmem [resolvable:$true] %s151_s26 }
  0x39   : > { %s138_s30 = scalar_lea.sflag [#allocation4], %s495_s21  ;;  %s310_s2 = scalar_lea.vmem %s504_s26, 128 }
  0x3a   : > { %v134_v2 = vmul.f32 %v133_v1, %v133_v1  ;;  %p311_p6 = scmp.ne.s32.totalorder %s504_s26, %s310_s2  ;;  %p561_p11 = scmp.ne.s32.totalorder %s556_s18, 0 }
  0x3b   : > { %s379_s10 = smov [#allocation5]  }
  0x3c   : > { %v229_v3 = vadd.f32 -1.4551915e-11, %v134_v2  ;;  %p312_p12 = pnand %p311_p6, %p561_p11  ;;  %s314_s3 = sshll.u32 %s379_s10, 4  ;;  %s315_s3 = int_to_ptr.vmem [resolvable:$false] %s314_s3 }
  0x3d   : > { %s316_s4 = scalar_lea.vmem %s315_s3, 256  ;;  %p317_p7 = scmp.lt.s32.totalorder %s504_s26, %s315_s3 }
  0x3e   : > { %136 = vst [vmem:[%s131_s25] sm:$0xff] %v229_v3  ;;  %p313_p13 = pneg %p312_p12  ;;  %p318_p10 = scmp.lt.s32.totalorder %s316_s4, %s310_s2 }
  0x40   : > { %p319_p2 = por %p318_p10, %p317_p7 }
  0x42   : > { %p320_p4 = pnand %p319_p2, %p313_p13 }
  0x44   : > { %323 = shalt.err (!%p320_p4)
}
  0x45   : > { %s324_s5 = scalar_lea.hbm %s509_s17, 128  ;;  %s328_s14 = scalar_lea.hbm %s552_s1, 256 }
  0x46   : > { %p325_p5 = scmp.ne.s32.totalorder %s509_s17, %s324_s5  ;;  %p329_p0 = scmp.lt.u32.totalorder %s509_s17, %s552_s1 }
  0x47   : > { %p330_p1 = scmp.lt.u32.totalorder %s328_s14, %s324_s5  ;;  %p332_p6 = scmp.lt.u32.totalorder %s324_s5, %s509_s17 }
  0x48   : > { %p326_p8 = pnand %p325_p5, %p561_p11 }
  0x49   : > { %p331_p3 = por %p330_p1, %p329_p0 }
  0x4a   : > { %p327_p9 = pneg %p326_p8 }
  0x4b   : > { %p333_p12 = por %p332_p6, %p331_p3 }
  0x4d   : > { %p334_p13 = pnand %p333_p12, %p327_p9 }
  0x4f   : > { %337 = shalt.err (!%p334_p13)
}
  0x50   : > { %236 = dma.vmem_to_hbm [thread:$0]  (%p561_p11), %s504_s26, 128, %s509_s17, %s138_s30  }
  0x51 PF: > { %s163_s21 = sand.u32 1, %s364_s6   ;;  %p562_p7 = scmp.ne.s32.totalorder %s557_s19, 0 }
  0x52   : > { %p563_p10 = scmp.ge.s32.totalorder %s376_s9, 2  ;;  %s164_s22 = scalar_lea.sflag [#allocation4], %s163_s21 }
  0x54   : > { %p243_p2 = pnand %p563_p10, %p562_p7 }
  0x56   : > { %359 = dma.done.wait (!%p243_p2), %s164_s22, 128  }
  0x57   : > { %361 = vsyncadd (!%p243_p2), %s164_s22, 4294967168  ;;  %p14_p4 = scmp.ge.s32.totalorder %s415_s12, 4   ;;  %s564_s6 = smov %s368_s7 }
  0x58   : > { %s565_s7 = smov %s372_s8  ;;  %s566_s8 = smov %s427_s15 }
  0x59   : > { %s567_s9 = smov %s415_s12  ;;  %16 = sbr.rel (!%p14_p4) target bundleno = 5 (0x5), region = 69 }
  0x60   :  { %169 = vsyncpa [#allocation3], 1 }
  0x61   :  { %171 = vsyncpa [#allocation3 + $0x1], 1 }
  0x62   :  { %172 = vsyncpa [#allocation4], 1 }
  0x63   :  { %174 = vsyncpa [#allocation4 + $0x1], 1 }

</bundles_post_ra>
